<compile_context>
chip_gen: v7x
topology: tpu7x:2x2x1
jax: 0.10.0
libtpu: 0.0.40
codegen_flags: <defaults>
</compile_context>

<pallas_src>
import jax
import jax.numpy as jnp
from jax import lax
from jax.experimental import pallas as pl
from jax.experimental.pallas import tpu as pltpu

H1, H2, H3 = 32, 16, 1  # hidden sizes from the module definition


def mlp_kernel(x_ref, w1_ref, b1_ref, w2_ref, b2_ref, w3r_ref, b3_ref, o_ref):
    # Full forward pass fused in one kernel invocation per batch tile.
    x = x_ref[...].astype(jnp.float32)                                   # (TB, D) stream
    h1 = jnp.dot(x, w1_ref[...], preferred_element_type=jnp.float32)     # (TB, 32) MXU
    h1 = jnp.maximum(h1 + b1_ref[...], 0.0)                              # ReLU
    h2 = jnp.dot(h1, w2_ref[...], preferred_element_type=jnp.float32)    # (TB, 16) MXU
    h2 = jnp.maximum(h2 + b2_ref[...], 0.0)                              # ReLU
    # fc3, lane-dense: (1,16) . (TB,16)^T -> (1, TB). Batch lands on lanes so the sigmoid
    # runs on full vregs and the store is unmasked (the big store-side lever).
    h3 = lax.dot_general(w3r_ref[...], h2,
                         dimension_numbers=(((1,), (1,)), ((), ())),
                         preferred_element_type=jnp.float32)              # (1, TB)
    o_ref[...] = jax.nn.sigmoid(h3 + b3_ref[...])                         # (1, TB)


def _round_up(n, m):
    return ((n + m - 1) // m) * m


def _num_tensorcores():
    """Best-effort TensorCores-per-chip query (2 on v7x, 1 on v5e/v6e)."""
    try:
        info = pltpu.get_tpu_info()
        for attr in ("num_cores", "core_count", "num_tensorcores", "tensorcores_per_chip"):
            n = getattr(info, attr, None)
            if isinstance(n, int) and n > 0:
                return min(int(n), 2)
    except Exception:
        pass
    try:
        if "v7" in jax.devices()[0].device_kind.lower():
            return 2
    except Exception:
        pass
    return 1


def _est_vmem_bytes(tile_b, d, x_itemsize):
    x_bytes = 2 * tile_b * d * x_itemsize                    # double-buffered x stream
    out_bytes = 2 * tile_b * 4                               # double-buffered (1, TB) out
    inter = 4 * tile_b * (H1 + 2 * H2 + 1)                   # h1, h2 (+relayout), fc3 row
    params = 4 * (d * H1 + H1 + H1 * H2 + 2 * H2 + H3)       # resident weights/biases
    return x_bytes + out_bytes + inter + params


def _choose_tile_b(batch, max_tile_b, num_tc, d, x_itemsize, vmem_budget):
    """Biggest batch tile the roofline wants. tile is either == batch (full-array blocks,
    grid=1) or a multiple of 128 so the lane-dense (1, tile) output block stays legal."""
    max_tile_b = max(128, _round_up(max_tile_b, 128))
    if batch <= max_tile_b:
        if num_tc >= 2 and batch >= 2 * 128:
            # Only split when the chip actually has 2 TensorCores (v7x) so the
            # "parallel" batch axis feeds both; on v5e/v6e extra steps are pure overhead.
            tile = min(max_tile_b, _round_up(pl.cdiv(batch, num_tc), 128))
        else:
            tile = batch                      # one full-array tile, grid == 1
    else:
        tile = max_tile_b
    # Shrink (keeping 128-row granules) if a very large input_dim would blow VMEM.
    while tile > 128 and _est_vmem_bytes(tile, d, x_itemsize) > vmem_budget:
        tile = max(128, _round_up(pl.cdiv(tile, 2), 128))
    return tile


def mlp_classifier_forward(x, params, *, max_tile_b=16384, stream_dtype=jnp.bfloat16,
                           vmem_budget_bytes=20 * 1024 * 1024):
    """x: (B, D). params: dict of w1,b1,w2,b2,w3,b3 (f32). Returns (B, 1) float32.

    stream_dtype=jnp.bfloat16 halves HBM bytes for the streamed x (f32 accumulation is
    kept inside the kernel); pass stream_dtype=None to stream x unmodified.
    """
    B, D = x.shape
    if stream_dtype is not None and x.dtype != stream_dtype:
        x = x.astype(stream_dtype)  # ideally the producer emits this dtype directly

    num_tc = _num_tensorcores()
    tile_b = _choose_tile_b(B, max_tile_b, num_tc, D, x.dtype.itemsize, vmem_budget_bytes)
    grid = (pl.cdiv(B, tile_b),)   # ragged last block allowed; no jnp.pad needed

    w1, b1 = params["w1"], params["b1"]
    w2, b2 = params["w2"], params["b2"]
    w3, b3 = params["w3"], params["b3"]
    w3_row = w3.reshape(1, H2)     # (16,1) -> (1,16) row operand for the lane-dense fc3

    # Constant-index_map operands only need a single resident VMEM buffer.
    resident = pl.Buffered(1)

    est_vmem = _est_vmem_bytes(tile_b, D, x.dtype.itemsize)
    vmem_limit = int(min(max(2 * est_vmem, 32 * 1024 * 1024), 48 * 1024 * 1024))

    out = pl.pallas_call(
        mlp_kernel,
        out_shape=jax.ShapeDtypeStruct((1, B), jnp.float32),   # lane-dense: batch on lanes
        grid_spec=pltpu.PrefetchScalarGridSpec(
            num_scalar_prefetch=0,
            grid=grid,
            in_specs=[
                # x: tiled along batch, pipelined/double-buffered by default.
                pl.BlockSpec((tile_b, D), lambda i: (i, 0)),
                # weights/biases: full arrays, single-buffered residents.
                pl.BlockSpec((D, H1), lambda i: (0, 0), pipeline_mode=resident),
                pl.BlockSpec((1, H1), lambda i: (0, 0), pipeline_mode=resident),
                pl.BlockSpec((H1, H2), lambda i: (0, 0), pipeline_mode=resident),
                pl.BlockSpec((1, H2), lambda i: (0, 0), pipeline_mode=resident),
                pl.BlockSpec((1, H2), lambda i: (0, 0), pipeline_mode=resident),  # w3 row
                pl.BlockSpec((1, H3), lambda i: (0, 0), pipeline_mode=resident),
            ],
            out_specs=pl.BlockSpec((1, tile_b), lambda i: (0, i)),
        ),
        compiler_params=pltpu.CompilerParams(
            dimension_semantics=("parallel",),
            vmem_limit_bytes=vmem_limit,
        ),
    )(x, w1, b1, w2, b2, w3_row, b3)

    return out.reshape(B, 1)


def init_params(key, input_dim):
    """Deterministic init mimicking PyTorch Linear (uniform in +/- 1/sqrt(fan_in))."""
    def linear(k, fan_in, fan_out):
        kw, kb = jax.random.split(k)
        bound = 1.0 / jnp.sqrt(jnp.float32(fan_in))
        w = jax.random.uniform(kw, (fan_in, fan_out), jnp.float32, -bound, bound)
        b = jax.random.uniform(kb, (1, fan_out), jnp.float32, -bound, bound)
        return w, b

    k1, k2, k3 = jax.random.split(key, 3)
    w1, b1 = linear(k1, input_dim, H1)
    w2, b2 = linear(k2, H1, H2)
    w3, b3 = linear(k3, H2, H3)
    return {"w1": w1, "b1": b1, "w2": w2, "b2": b2, "w3": w3, "b3": b3}


def mlp_reference(x, p, stream_dtype=None):
    xf = x.astype(stream_dtype) if stream_dtype is not None else x
    xf = xf.astype(jnp.float32)
    h1 = jnp.maximum(xf @ p["w1"] + p["b1"], 0.0)
    h2 = jnp.maximum(h1 @ p["w2"] + p["b2"], 0.0)
    return jax.nn.sigmoid(h2 @ p["w3"] + p["b3"])


if __name__ == "__main__":
    key = jax.random.PRNGKey(0)
    k_params, k_x = jax.random.split(key)

    batch, input_dim = 16, 64
    params = init_params(k_params, input_dim)
    x = jax.random.normal(k_x, (batch, input_dim), jnp.float32)
    ref = mlp_reference(x, params)

    # Exact-precision path (f32 streaming) vs. the f32 reference -> tight tolerance.
    out_f32 = jax.block_until_ready(mlp_classifier_forward(x, params, stream_dtype=None))
    assert out_f32.shape == (batch, 1)
    assert jnp.allclose(out_f32, ref, atol=1e-5, rtol=1e-5), "mismatch (f32 stream)"

    # Default fast path: bf16 streaming with f32 accumulation.
    out_bf16 = jax.block_until_ready(mlp_classifier_forward(x, params))
    assert out_bf16.shape == (batch, 1)
    assert jnp.allclose(out_bf16, mlp_reference(x, params, jnp.bfloat16),
                        atol=1e-4, rtol=1e-4), "mismatch (bf16 stream vs matched ref)"
    assert jnp.allclose(out_bf16, ref, atol=5e-3, rtol=0.0), "bf16 stream too lossy"

    # Ragged small batch (B=13): pad-free full-array tile, grid == 1.
    x2 = jax.random.normal(jax.random.PRNGKey(1), (13, input_dim), jnp.float32)
    out2 = jax.block_until_ready(mlp_classifier_forward(x2, params, stream_dtype=None))
    assert out2.shape == (13, 1)
    assert jnp.allclose(out2, mlp_reference(x2, params), atol=1e-5, rtol=1e-5), \
        "mismatch (ragged B=13)"

    # Multi-step grid with a ragged last block (B=300, forced 128-row tiles): exercises
    # the no-pad boundary handling (out-of-bounds rows computed then discarded).
    x3 = jax.random.normal(jax.random.PRNGKey(2), (300, input_dim), jnp.float32)
    out3 = jax.block_until_ready(
        mlp_classifier_forward(x3, params, stream_dtype=None, max_tile_b=128))
    assert out3.shape == (300, 1)
    assert jnp.allclose(out3, mlp_reference(x3, params), atol=1e-5, rtol=1e-5), \
        "mismatch (ragged grid B=300)"

    print("KERNEL_OK")
</pallas_src>

<mosaic_0001>
module attributes {stable_mosaic.version = 11 : i64} {
  func.func @mlp_kernel(%arg0: i32, %arg1: memref<16x64xf32, #tpu.memory_space<vmem>>, %arg2: memref<64x32xf32, #tpu.memory_space<vmem>>, %arg3: memref<1x32xf32, #tpu.memory_space<vmem>>, %arg4: memref<32x16xf32, #tpu.memory_space<vmem>>, %arg5: memref<1x16xf32, #tpu.memory_space<vmem>>, %arg6: memref<1x16xf32, #tpu.memory_space<vmem>>, %arg7: memref<1x1xf32, #tpu.memory_space<vmem>>, %arg8: memref<1x16xf32, #tpu.memory_space<vmem>>) attributes {dimension_semantics = [#tpu.dimension_semantics<parallel>], iteration_bounds = array<i64: 1>, scalar_prefetch = 0 : i64, scratch_operands = 0 : i64, tpu.core_type = #tpu.core_type<tc>, window_params = [{transform_indices = @transform_0, window_bounds = array<i64: 16, 64>}, {pipeline_mode = #tpu.pipeline_mode<synchronous>, transform_indices = @transform_1, window_bounds = array<i64: 64, 32>}, {pipeline_mode = #tpu.pipeline_mode<synchronous>, transform_indices = @transform_2, window_bounds = array<i64: 1, 32>}, {pipeline_mode = #tpu.pipeline_mode<synchronous>, transform_indices = @transform_3, window_bounds = array<i64: 32, 16>}, {pipeline_mode = #tpu.pipeline_mode<synchronous>, transform_indices = @transform_4, window_bounds = array<i64: 1, 16>}, {pipeline_mode = #tpu.pipeline_mode<synchronous>, transform_indices = @transform_5, window_bounds = array<i64: 1, 16>}, {pipeline_mode = #tpu.pipeline_mode<synchronous>, transform_indices = @transform_6, window_bounds = array<i64: 1, 1>}, {transform_indices = @transform_7, window_bounds = array<i64: 1, 16>}]} {
    %c0 = arith.constant 0 : index
    %c0_0 = arith.constant 0 : index
    %0 = vector.load %arg1[%c0, %c0_0] : memref<16x64xf32, #tpu.memory_space<vmem>>, vector<16x64xf32>
    %c0_1 = arith.constant 0 : index
    %c0_2 = arith.constant 0 : index
    %1 = vector.load %arg2[%c0_1, %c0_2] : memref<64x32xf32, #tpu.memory_space<vmem>>, vector<64x32xf32>
    %cst = arith.constant dense<0.000000e+00> : vector<16x32xf32>
    %2 = tpu.matmul %0, %1, %cst {dimension_numbers = #tpu.dot_dimension_numbers<[1], [0], [0], [1], [0, 0, 1, 1], [], []>} : vector<16x64xf32>, vector<64x32xf32>, vector<16x32xf32> -> vector<16x32xf32>
    %c0_3 = arith.constant 0 : index
    %c0_4 = arith.constant 0 : index
    %3 = vector.load %arg3[%c0_3, %c0_4] : memref<1x32xf32, #tpu.memory_space<vmem>>, vector<1x32xf32>
    %4 = vector.broadcast %3 : vector<1x32xf32> to vector<16x32xf32>
    %5 = arith.addf %2, %4 : vector<16x32xf32>
    %cst_5 = arith.constant 0.000000e+00 : f32
    %6 = vector.broadcast %cst_5 : f32 to vector<16x32xf32>
    %7 = arith.maximumf %5, %6 : vector<16x32xf32>
    %c0_6 = arith.constant 0 : index
    %c0_7 = arith.constant 0 : index
    %8 = vector.load %arg4[%c0_6, %c0_7] : memref<32x16xf32, #tpu.memory_space<vmem>>, vector<32x16xf32>
    %cst_8 = arith.constant dense<0.000000e+00> : vector<16x16xf32>
    %9 = tpu.matmul %7, %8, %cst_8 {dimension_numbers = #tpu.dot_dimension_numbers<[1], [0], [0], [1], [0, 0, 1, 1], [], []>} : vector<16x32xf32>, vector<32x16xf32>, vector<16x16xf32> -> vector<16x16xf32>
    %c0_9 = arith.constant 0 : index
    %c0_10 = arith.constant 0 : index
    %10 = vector.load %arg5[%c0_9, %c0_10] : memref<1x16xf32, #tpu.memory_space<vmem>>, vector<1x16xf32>
    %11 = vector.broadcast %10 : vector<1x16xf32> to vector<16x16xf32>
    %12 = arith.addf %9, %11 : vector<16x16xf32>
    %cst_11 = arith.constant 0.000000e+00 : f32
    %13 = vector.broadcast %cst_11 : f32 to vector<16x16xf32>
    %14 = arith.maximumf %12, %13 : vector<16x16xf32>
    %c0_12 = arith.constant 0 : index
    %c0_13 = arith.constant 0 : index
    %15 = vector.load %arg6[%c0_12, %c0_13] : memref<1x16xf32, #tpu.memory_space<vmem>>, vector<1x16xf32>
    %cst_14 = arith.constant dense<0.000000e+00> : vector<1x16xf32>
    %16 = tpu.matmul %15, %14, %cst_14 {dimension_numbers = #tpu.dot_dimension_numbers<[1], [1], [0], [0], [0, 0, 1, 0], [], []>} : vector<1x16xf32>, vector<16x16xf32>, vector<1x16xf32> -> vector<1x16xf32>
    %c0_15 = arith.constant 0 : index
    %c0_16 = arith.constant 0 : index
    %17 = vector.load %arg7[%c0_15, %c0_16] : memref<1x1xf32, #tpu.memory_space<vmem>>, vector<1x1xf32>
    %18 = vector.broadcast %17 : vector<1x1xf32> to vector<1x16xf32>
    %19 = arith.addf %16, %18 : vector<1x16xf32>
    %20 = arith.negf %19 : vector<1x16xf32>
    %21 = math.exp %20 : vector<1x16xf32>
    %cst_17 = arith.constant 1.000000e+00 : f32
    %22 = vector.broadcast %cst_17 : f32 to vector<1x16xf32>
    %23 = arith.addf %22, %21 : vector<1x16xf32>
    %24 = arith.divf %22, %23 : vector<1x16xf32>
    %c0_18 = arith.constant 0 : index
    %c0_19 = arith.constant 0 : index
    %25 = vector.load %arg8[%c0_18, %c0_19] : memref<1x16xf32, #tpu.memory_space<vmem>>, vector<1x16xf32>
    tpu.vector_store %arg8[%c0_18, %c0_19], %24 {strides = array<i32>} : memref<1x16xf32, #tpu.memory_space<vmem>>, vector<1x16xf32>,
    return
  }
  func.func @transform_0(%arg0: i32) -> (i32, i32) {
    %c0_i32 = arith.constant 0 : i32
    %c0_i32_0 = arith.constant 0 : i32
    return %arg0, %c0_i32 : i32, i32
  }
  func.func @transform_1(%arg0: i32) -> (i32, i32) {
    %c0_i32 = arith.constant 0 : i32
    %c0_i32_0 = arith.constant 0 : i32
    %c0_i32_1 = arith.constant 0 : i32
    return %c0_i32, %c0_i32_0 : i32, i32
  }
  func.func @transform_2(%arg0: i32) -> (i32, i32) {
    %c0_i32 = arith.constant 0 : i32
    %c0_i32_0 = arith.constant 0 : i32
    %c0_i32_1 = arith.constant 0 : i32
    return %c0_i32, %c0_i32_0 : i32, i32
  }
  func.func @transform_3(%arg0: i32) -> (i32, i32) {
    %c0_i32 = arith.constant 0 : i32
    %c0_i32_0 = arith.constant 0 : i32
    %c0_i32_1 = arith.constant 0 : i32
    return %c0_i32, %c0_i32_0 : i32, i32
  }
  func.func @transform_4(%arg0: i32) -> (i32, i32) {
    %c0_i32 = arith.constant 0 : i32
    %c0_i32_0 = arith.constant 0 : i32
    %c0_i32_1 = arith.constant 0 : i32
    return %c0_i32, %c0_i32_0 : i32, i32
  }
  func.func @transform_5(%arg0: i32) -> (i32, i32) {
    %c0_i32 = arith.constant 0 : i32
    %c0_i32_0 = arith.constant 0 : i32
    %c0_i32_1 = arith.constant 0 : i32
    return %c0_i32, %c0_i32_0 : i32, i32
  }
  func.func @transform_6(%arg0: i32) -> (i32, i32) {
    %c0_i32 = arith.constant 0 : i32
    %c0_i32_0 = arith.constant 0 : i32
    %c0_i32_1 = arith.constant 0 : i32
    return %c0_i32, %c0_i32_0 : i32, i32
  }
  func.func @transform_7(%arg0: i32) -> (i32, i32) {
    %c0_i32 = arith.constant 0 : i32
    %c0_i32_0 = arith.constant 0 : i32
    return %c0_i32, %arg0 : i32, i32
  }
}

</mosaic_0001>

<bundles_post_ra>
// kernel: tpu_custom_call.1
= control target key start
LH: loop header
LB: loop body
LE: loop exit
PB: predicated region body
PF: predicated region fallthrough
CT: control target
= control target key end

     0   :  { %s579_s0 = inlined_call_operand.vmem [shape: f32[16,64], index: 0, kind: input, shape index: {}]   ;;  %s580_s1 = inlined_call_operand.vmem [shape: f32[64,32], index: 1, kind: input, shape index: {}]   ;;  %s581_s2 = inlined_call_operand.vmem [shape: f32[1,32], index: 2, kind: input, shape index: {}]   ;;  %s582_s3 = inlined_call_operand.vmem [shape: f32[32,16], index: 3, kind: input, shape index: {}]   ;;  %s583_s4 = inlined_call_operand.vmem [shape: f32[1,16], index: 4, kind: input, shape index: {}]   ;;  %s584_s5 = inlined_call_operand.vmem [shape: f32[1,16], index: 5, kind: input, shape index: {}]   ;;  %s585_s6 = inlined_call_operand.<no memory space> [shape: f32[1,1], index: 6, kind: input, shape index: {}]   ;;  %s586_s7 = inlined_call_operand.hbm [shape: f32[1,16], index: 7, kind: output, shape index: {}]  }
   0x1   :  { %v12_v0 = vstv %s585_s6 }
   0x2   :  { %13 = vst [vmem:[#allocation2] sm:$0x1] %v12_v0 }
   0x3   :  { %v31_v1 = vld [vmem:[%s580_s1] sm:$0xff]  ;;  %v32_v2 = vld [vmem:[%s580_s1 + $0x8] sm:$0xff]  ;;  %v33_v3 = vld [vmem:[%s580_s1 + $0x10] sm:$0xff]  ;;  %vm46_vm0 = vcmask 523264  }
   0x4   :  { %v404_v4 = vpack.c.bf16 %v32_v2, %v31_v1  ;;  %v34_v5 = vld [vmem:[%s580_s1 + $0x18] sm:$0xff]  ;;  %v35_v7 = vld [vmem:[%s580_s1 + $0x20] sm:$0xff]  ;;  %v36_v8 = vld [vmem:[%s580_s1 + $0x28] sm:$0xff] }
   0x5   :  { %v408_v6 = vpack.c.bf16 %v34_v5, %v33_v3  ;;  %v29_v9 = vld [vmem:[%s579_s0] sm:$0xff]  ;;  %v131_v11 = vld [vmem:[%s582_s3 + $0x8] sm:$0xff] }
   0x6   :  { %405 = vmatprep.subr.bf16.mxu0 %v404_v4  ;;  %383 = vmatprep.mubr.msk.f32.mxu0 %vm46_vm0, %v29_v9  ;;  %v130_v10 = vld [vmem:[%s582_s3] sm:$0xff] }
   0x7   :  { %407 = vmatpush3.bf16.msra.mxu0 %v404_v4  ;;  %v420_v12 = vpack.c.bf16 %v131_v11, %v130_v10 }
   0x8   :  { %14 = vsyncpa [#allocation4], 0  ;;  %409 = vmatprep.subr.bf16.mxu0 %v408_v6  ;;  %v412_v13 = vpack.c.bf16 %v36_v8, %v35_v7  ;;  %v37_v14 = vld [vmem:[%s580_s1 + $0x30] sm:$0xff]  ;;  %v38_v15 = vld [vmem:[%s580_s1 + $0x38] sm:$0xff]  ;;  %vm141_vm1 = vcmask 261120   ;;  %v466_v28 = vmov 0.0|0.0   ;;  %v232_v41 = vlaneseq }
   0x9   :  { %421 = vmatprep.subr.bf16.mxu1 %v420_v12  ;;  %v416_v16 = vpack.c.bf16 %v38_v15, %v37_v14  ;;  %v30_v17 = vld [vmem:[%s579_s0 + $0x8] sm:$0xff]  ;;  %v132_v18 = vld [vmem:[%s582_s3 + $0x10] sm:$0xff]  ;;  %v133_v19 = vld [vmem:[%s582_s3 + $0x18] sm:$0xff]  ;;  %vm467_vm2 = vmmov 0   ;;  %v468_v29 = vmov 0.0   ;;  %v469_v31 = vmov 0  }
   0xa   :  { %423 = vmatpush3.bf16.msra.mxu1 %v420_v12  ;;  %v424_v20 = vpack.c.bf16 %v133_v19, %v132_v18  ;;  %v338_v21 = vld [vmem:[%s581_s2] ss:$0 sm:$0xff]  ;;  %437 = vset.pattern.permute.xlu0 %v469_v31  ;;  %vm236_vm3 = vcmask 130048   ;;  %v233_v42 = vshrl.u32 %v232_v41, 7  ;;  %vm322_vm5 = vcmask 122880  }
   0xb   :  { %411 = vmatpush3.bf16.msra.mxu0 %v408_v6  ;;  %v226_v30 = vld [vmem:[#allocation2] sm:$0x1]  ;;  %vm430_vm4 = vmpackc.low %vm236_vm3, %vm236_vm3 }
   0xc   :  { %413 = vmatprep.subr.bf16.mxu0 %v412_v13  ;;  %425 = vmatprep.subr.bf16.mxu1 %v424_v20  ;;  %v341_v32 = vld [vmem:[%s583_s4] ss:$0 sm:$0xff]  ;;  %v234_v43 = vsub.s32 0, %v233_v42  ;;  %s470_s4 = smov [#allocation3]  }
   0xd   :  { %229 = vperm.xlu0 %437, %v226_v30   ;;  %v225_v40 = vld [vmem:[%s584_s5] sm:$0x1]  ;;  %s330_s9 = sshll.u32 %s470_s4, 4  ;;  %s331_s9 = int_to_ptr.vmem [resolvable:$true] %s330_s9 }
   0xe   :  { %427 = vmatpush3.bf16.msra.mxu1 %v424_v20  ;;  %s442_s5 = scalar_lea.vmem %s331_s9, 16  ;;  %s446_s10 = scalar_lea.vmem %s331_s9, 32 }
   0xf   :  { %415 = vmatpush3.bf16.msra.mxu0 %v412_v13  ;;  %428 = vmatprep.subr.bf16.mxu1 %v466_v28  ;;  %p443_p0 = scmp.ne.s32.totalorder %s331_s9, %s442_s5  ;;  %p447_p1 = scmp.lt.s32.totalorder %s331_s9, %s331_s9 }
  0x10   :  { %417 = vmatprep.subr.bf16.mxu0 %v416_v16  ;;  %p448_p2 = scmp.lt.s32.totalorder %s446_s10, %s442_s5 }
  0x12   :  { %p449_p3 = por %p448_p2, %p447_p1 }
  0x13   :  { %419 = vmatpush3.bf16.msra.mxu0 %v416_v16 }
  0x14   :  { %p450_p4 = pnand %p449_p3, %p443_p0 }
  0x16   :  { %384 = vmatmul.mubr.msk.f32.vlgmr.msra.gmra.mrb[0].mxu0 %vm46_vm0, %v30_v17 }
  0x8c   :  { %v230_v44 = vpop.permute.xlu0 %229 }
  0x8d   :  { %v235_v45 = vrot.slane %v230_v44, %v234_v43 }
  0xe9   :  { %v385_v22 = vpop.f32.mrb[0].mxu0 }
  0xea   :  { %v125_v23 = vadd.f32 %v385_v22, %v338_v21  ;;  %v119_v24 = vpop.f32.mrb[1].mxu0 }
  0xeb   :  { %v120_v25 = vadd.f32 %v338_v21, %v119_v24 }
  0xec   :  { %v129_v27 = vmax.f32 %v125_v23, 0.0 }
  0xed   :  { %v128_v26 = vmax.f32 %v120_v25, 0.0 }
  0xef   :  { %394 = vmatprep.mubr.msk.f32.mxu1 %vm141_vm1, %v128_v26 }
  0xf0   :  { %395 = vmatmul.mubr.msk.f32.vlgmr.msra.gmra.mrb[0].mxu1 %vm141_vm1, %v129_v27 }
  0xf1   :  { %401 = vmatprep.mubr.msk.f32.mxu1 %vm467_vm2, %v468_v29 }
 0x1c3   :  { %v396_v33 = vpop.f32.mrb[0].mxu1 }
 0x1c4   :  { %v220_v34 = vadd.f32 %v396_v33, %v341_v32  ;;  %v214_v35 = vpop.f32.mrb[1].mxu1 }
 0x1c5   :  { %v215_v36 = vadd.f32 %v341_v32, %v214_v35 }
 0x1c6   :  { %v224_v37 = vmax.f32 %v220_v34, 0.0 }
 0x1c7   :  { %v223_v38 = vmax.f32 %v215_v36, 0.0 }
 0x1c9   :  { %v429_v39 = vpack.c.bf16 %v224_v37, %v223_v38 }
 0x1cb   :  { %431 = vmatpush3.bf16.xpose.msk.msra.mxu1 %vm430_vm4, %v429_v39 }
 0x1d2   :  { %402 = vmatmul.mubr.msk.f32.vlgmr.msra.gmra.mrb[2].mxu1 %vm236_vm3, %v225_v40 }
 0x2a5   :  { %v312_v46 = vpop.f32.mrb[2].mxu1 }
 0x2a6   :  { %v313_v47 = vadd.f32 %v312_v46, %v235_v45  ;;  %v403_v48 = vpop.f32.mrb[3].mxu1 }
 0x2a8   :  { %v347_v49 = vmul.f32 -1.442695, %v313_v47 }
 0x2aa   :  { %438 = vpow2.f32 %v347_v49 }
 0x2b4   :  { %v439_v50 = vpop.eup %438 }
 0x2b5   :  { %v319_v51 = vadd.f32 1.0, %v439_v50 }
 0x2b7   :  { %440 = vrcp.f32 %v319_v51 }
 0x2c1   :  { %v441_v52 = vpop.eup %440 }
 0x2c2   :  { %323 = vst.msk [vmem:[#allocation3] sm:$0x1] %vm322_vm5, %v441_v52 }
 0x2c3   :  { %453 = shalt.err (!%p450_p4)
}
 0x2c4   :  { %s454_s12 = scalar_lea.hbm %s586_s7, 16 }
 0x2c5   :  { %p455_p5 = scmp.ne.s32.totalorder %s586_s7, %s454_s12  ;;  %p458_p6 = scmp.lt.u32.totalorder %s454_s12, %s586_s7 }
 0x2c7   :  { %p460_p7 = pnand %p458_p6, %p455_p5 }
 0x2c9   :  { %463 = shalt.err (!%p460_p7)
}
 0x2ca   :  { %333 = dma.vmem_to_hbm [thread:$0]  %s331_s9, 16, %s586_s7, [#allocation4]  }
 0x2cb   :  { %464 = dma.done.wait [#allocation4], 16  }
 0x2cc   :  { %465 = vsyncadd [#allocation4], 4294967280 }
 0x2cd   :  { %337 = vsyncpa [#allocation4], 1 }

</bundles_post_ra>
